<compile_context>
chip_gen: v7x
topology: tpu7x:2x2x1
jax: 0.10.0
libtpu: 0.0.40
codegen_flags: <defaults>
</compile_context>

<pallas_src>
import functools
import math

import jax
import jax.numpy as jnp
from jax.experimental import pallas as pl
from jax.experimental.pallas import tpu as pltpu


def _attention_kernel(x_ref, wqkv_ref, wout_ref, bout_ref, o_ref, *,
                      b, n, heads, dim_head, scale):
    x = x_ref[...].astype(jnp.float32)        # (b*n, dim)
    wqkv = wqkv_ref[...].astype(jnp.float32)  # (dim, 3*inner)
    wout = wout_ref[...].astype(jnp.float32)  # (inner, dim)
    bout = bout_ref[...].astype(jnp.float32)  # (1, dim)

    inner = heads * dim_head
    dim = x.shape[-1]

    # qkv projection for the whole batch in one MXU matmul (to_qkv, bias=False).
    qkv = jnp.dot(x, wqkv, preferred_element_type=jnp.float32)      # (b*n, 3*inner)

    def split_heads(mat):
        # (b*n, inner) -> (heads*b, n, dim_head); static lane slices plus
        # leading-dim reshapes/concat only (n == 8 rows per batch slice is
        # exactly one sublane tile), no in-kernel transposes.
        slabs = [mat[:, h * dim_head:(h + 1) * dim_head].reshape(b, n, dim_head)
                 for h in range(heads)]
        return jnp.concatenate(slabs, axis=0)

    q = split_heads(qkv[:, 0 * inner:1 * inner])
    k = split_heads(qkv[:, 1 * inner:2 * inner])
    v = split_heads(qkv[:, 2 * inner:3 * inner])

    # Batched attention scores for all (head, batch) pairs at once.
    s = jnp.einsum('bnd,bmd->bnm', q, k,
                   preferred_element_type=jnp.float32) * scale      # (h*b, n, n)

    # softmax(dim=-1), applied once on the full (h*b, n, n) tensor.
    s = s - jnp.max(s, axis=-1, keepdims=True)
    e = jnp.exp(s)
    p = e / jnp.sum(e, axis=-1, keepdims=True)

    o = jnp.einsum('bnm,bmd->bnd', p, v,
                   preferred_element_type=jnp.float32)               # (h*b, n, dh)

    # Output projection (to_out Linear) folded into a per-head accumulation:
    #   concat_h(out_h) @ Wout == sum_h out_h @ Wout[h*dh:(h+1)*dh, :]
    acc = jnp.zeros((b * n, dim), jnp.float32)
    for h in range(heads):
        o_h = o[h * b:(h + 1) * b].reshape(b * n, dim_head)
        acc = acc + jnp.dot(o_h, wout[h * dim_head:(h + 1) * dim_head, :],
                            preferred_element_type=jnp.float32)
    o_ref[...] = (acc + bout).astype(o_ref.dtype)


def attention_forward(x, wqkv, wout, bout, *, heads, dim_head):
    """y = to_out( multi_head_attention( to_qkv(x) ) ), x: (b, n, dim)."""
    b, n, dim = x.shape
    inner = heads * dim_head
    x2d = x.reshape(b * n, dim)   # fold batch into the sublane axis; one grid step.
    kernel = functools.partial(_attention_kernel, b=b, n=n, heads=heads,
                               dim_head=dim_head, scale=dim_head ** -0.5)
    out2d = pl.pallas_call(
        kernel,
        out_shape=jax.ShapeDtypeStruct((b * n, dim), x.dtype),
        grid=(1,),
        in_specs=[
            pl.BlockSpec((b * n, dim), lambda i: (0, 0)),
            pl.BlockSpec((dim, 3 * inner), lambda i: (0, 0)),
            pl.BlockSpec((inner, dim), lambda i: (0, 0)),
            pl.BlockSpec((1, dim), lambda i: (0, 0)),
        ],
        out_specs=pl.BlockSpec((b * n, dim), lambda i: (0, 0)),
        compiler_params=pltpu.CompilerParams(
            dimension_semantics=("arbitrary",)),
    )(x2d, wqkv, wout, bout)
    return out2d.reshape(b, n, dim)


def _reference(x, wqkv, wout, bout, *, heads, dim_head):
    """Pure-JAX replica of the PyTorch Attention.forward (f32, high precision)."""
    hp = jax.lax.Precision.HIGHEST
    b, n, _ = x.shape
    qkv = jnp.einsum('bnd,de->bne', x, wqkv, precision=hp)
    q, k, v = jnp.split(qkv, 3, axis=-1)

    def to_heads(t):  # 'b n (h d) -> b h n d'
        return t.reshape(b, n, heads, dim_head).transpose(0, 2, 1, 3)

    q, k, v = to_heads(q), to_heads(k), to_heads(v)
    dots = jnp.einsum('bhid,bhjd->bhij', q, k, precision=hp) * (dim_head ** -0.5)
    attn = jax.nn.softmax(dots, axis=-1)
    o = jnp.einsum('bhij,bhjd->bhid', attn, v, precision=hp)
    o = o.transpose(0, 2, 1, 3).reshape(b, n, heads * dim_head)     # 'b h n d -> b n (h d)'
    return jnp.einsum('bne,ed->bnd', o, wout, precision=hp) + bout


if __name__ == "__main__":
    dim, heads, dim_head = 32, 4, 8
    batch, seq = 2, 8
    inner = heads * dim_head

    key = jax.random.PRNGKey(0)
    kx, kq, ko, kb = jax.random.split(key, 4)
    x = jax.random.normal(kx, (batch, seq, dim), dtype=jnp.float32)
    wqkv = jax.random.normal(kq, (dim, 3 * inner), jnp.float32) / math.sqrt(dim)
    wout = jax.random.normal(ko, (inner, dim), jnp.float32) / math.sqrt(inner)
    bout = 0.01 * jax.random.normal(kb, (1, dim), jnp.float32)

    fwd = jax.jit(functools.partial(attention_forward, heads=heads, dim_head=dim_head))
    y = fwd(x, wqkv, wout, bout)
    jax.block_until_ready(y)

    y_ref = _reference(x, wqkv, wout, bout, heads=heads, dim_head=dim_head)
    assert y.shape == (batch, seq, dim) and y.dtype == jnp.float32
    assert jnp.allclose(y, y_ref, atol=1e-3, rtol=1e-3)
    print("KERNEL_OK")
</pallas_src>

<mosaic_0001>
module attributes {stable_mosaic.version = 11 : i64} {
  func.func @_attention_kernel(%arg0: i32, %arg1: memref<16x32xf32, #tpu.memory_space<vmem>>, %arg2: memref<32x96xf32, #tpu.memory_space<vmem>>, %arg3: memref<32x32xf32, #tpu.memory_space<vmem>>, %arg4: memref<1x32xf32, #tpu.memory_space<vmem>>, %arg5: memref<16x32xf32, #tpu.memory_space<vmem>>) attributes {dimension_semantics = [#tpu.dimension_semantics<arbitrary>], iteration_bounds = array<i64: 1>, scalar_prefetch = 0 : i64, scratch_operands = 0 : i64, tpu.core_type = #tpu.core_type<tc>, window_params = [{pipeline_mode = #tpu.pipeline_mode<synchronous>, transform_indices = @transform_0, window_bounds = array<i64: 16, 32>}, {pipeline_mode = #tpu.pipeline_mode<synchronous>, transform_indices = @transform_1, window_bounds = array<i64: 32, 96>}, {pipeline_mode = #tpu.pipeline_mode<synchronous>, transform_indices = @transform_2, window_bounds = array<i64: 32, 32>}, {pipeline_mode = #tpu.pipeline_mode<synchronous>, transform_indices = @transform_3, window_bounds = array<i64: 1, 32>}, {pipeline_mode = #tpu.pipeline_mode<synchronous>, transform_indices = @transform_4, window_bounds = array<i64: 16, 32>}]} {
    %c0 = arith.constant 0 : index
    %c0_0 = arith.constant 0 : index
    %0 = vector.load %arg1[%c0, %c0_0] : memref<16x32xf32, #tpu.memory_space<vmem>>, vector<16x32xf32>
    %c0_1 = arith.constant 0 : index
    %c0_2 = arith.constant 0 : index
    %1 = vector.load %arg2[%c0_1, %c0_2] : memref<32x96xf32, #tpu.memory_space<vmem>>, vector<32x96xf32>
    %c0_3 = arith.constant 0 : index
    %c0_4 = arith.constant 0 : index
    %2 = vector.load %arg3[%c0_3, %c0_4] : memref<32x32xf32, #tpu.memory_space<vmem>>, vector<32x32xf32>
    %c0_5 = arith.constant 0 : index
    %c0_6 = arith.constant 0 : index
    %3 = vector.load %arg4[%c0_5, %c0_6] : memref<1x32xf32, #tpu.memory_space<vmem>>, vector<1x32xf32>
    %cst = arith.constant dense<0.000000e+00> : vector<16x96xf32>
    %4 = tpu.matmul %0, %1, %cst {dimension_numbers = #tpu.dot_dimension_numbers<[1], [0], [0], [1], [0, 0, 1, 1], [], []>} : vector<16x32xf32>, vector<32x96xf32>, vector<16x96xf32> -> vector<16x96xf32>
    %5 = vector.extract_strided_slice %4 {offsets = [0, 0], sizes = [16, 32], strides = [1, 1]} : vector<16x96xf32> to vector<16x32xf32>
    %6 = vector.extract_strided_slice %5 {offsets = [0, 0], sizes = [16, 8], strides = [1, 1]} : vector<16x32xf32> to vector<16x8xf32>
    %7 = vector.shape_cast %6 : vector<16x8xf32> to vector<2x8x8xf32>
    %8 = vector.extract_strided_slice %5 {offsets = [0, 8], sizes = [16, 8], strides = [1, 1]} : vector<16x32xf32> to vector<16x8xf32>
    %9 = vector.shape_cast %8 : vector<16x8xf32> to vector<2x8x8xf32>
    %10 = vector.extract_strided_slice %5 {offsets = [0, 16], sizes = [16, 8], strides = [1, 1]} : vector<16x32xf32> to vector<16x8xf32>
    %11 = vector.shape_cast %10 : vector<16x8xf32> to vector<2x8x8xf32>
    %12 = vector.extract_strided_slice %5 {offsets = [0, 24], sizes = [16, 8], strides = [1, 1]} : vector<16x32xf32> to vector<16x8xf32>
    %13 = vector.shape_cast %12 : vector<16x8xf32> to vector<2x8x8xf32>
    %14 = tpu.concatenate %7, %9, %11, %13 in 0 : vector<2x8x8xf32>, vector<2x8x8xf32>, vector<2x8x8xf32>, vector<2x8x8xf32> -> vector<8x8x8xf32>
    %15 = vector.extract_strided_slice %4 {offsets = [0, 32], sizes = [16, 32], strides = [1, 1]} : vector<16x96xf32> to vector<16x32xf32>
    %16 = vector.extract_strided_slice %15 {offsets = [0, 0], sizes = [16, 8], strides = [1, 1]} : vector<16x32xf32> to vector<16x8xf32>
    %17 = vector.shape_cast %16 : vector<16x8xf32> to vector<2x8x8xf32>
    %18 = vector.extract_strided_slice %15 {offsets = [0, 8], sizes = [16, 8], strides = [1, 1]} : vector<16x32xf32> to vector<16x8xf32>
    %19 = vector.shape_cast %18 : vector<16x8xf32> to vector<2x8x8xf32>
    %20 = vector.extract_strided_slice %15 {offsets = [0, 16], sizes = [16, 8], strides = [1, 1]} : vector<16x32xf32> to vector<16x8xf32>
    %21 = vector.shape_cast %20 : vector<16x8xf32> to vector<2x8x8xf32>
    %22 = vector.extract_strided_slice %15 {offsets = [0, 24], sizes = [16, 8], strides = [1, 1]} : vector<16x32xf32> to vector<16x8xf32>
    %23 = vector.shape_cast %22 : vector<16x8xf32> to vector<2x8x8xf32>
    %24 = tpu.concatenate %17, %19, %21, %23 in 0 : vector<2x8x8xf32>, vector<2x8x8xf32>, vector<2x8x8xf32>, vector<2x8x8xf32> -> vector<8x8x8xf32>
    %25 = vector.extract_strided_slice %4 {offsets = [0, 64], sizes = [16, 32], strides = [1, 1]} : vector<16x96xf32> to vector<16x32xf32>
    %26 = vector.extract_strided_slice %25 {offsets = [0, 0], sizes = [16, 8], strides = [1, 1]} : vector<16x32xf32> to vector<16x8xf32>
    %27 = vector.shape_cast %26 : vector<16x8xf32> to vector<2x8x8xf32>
    %28 = vector.extract_strided_slice %25 {offsets = [0, 8], sizes = [16, 8], strides = [1, 1]} : vector<16x32xf32> to vector<16x8xf32>
    %29 = vector.shape_cast %28 : vector<16x8xf32> to vector<2x8x8xf32>
    %30 = vector.extract_strided_slice %25 {offsets = [0, 16], sizes = [16, 8], strides = [1, 1]} : vector<16x32xf32> to vector<16x8xf32>
    %31 = vector.shape_cast %30 : vector<16x8xf32> to vector<2x8x8xf32>
    %32 = vector.extract_strided_slice %25 {offsets = [0, 24], sizes = [16, 8], strides = [1, 1]} : vector<16x32xf32> to vector<16x8xf32>
    %33 = vector.shape_cast %32 : vector<16x8xf32> to vector<2x8x8xf32>
    %34 = tpu.concatenate %27, %29, %31, %33 in 0 : vector<2x8x8xf32>, vector<2x8x8xf32>, vector<2x8x8xf32>, vector<2x8x8xf32> -> vector<8x8x8xf32>
    "tpu.trace_start"() <{level = 10 : i32, message = "bnd,bmd->bnm"}> : () -> ()
    %cst_7 = arith.constant dense<0.000000e+00> : vector<8x8x8xf32>
    %35 = tpu.matmul %14, %24, %cst_7 {dimension_numbers = #tpu.dot_dimension_numbers<[2], [2], [1], [1], [0, 0, 0, 1, 1, 1], [0], [0]>} : vector<8x8x8xf32>, vector<8x8x8xf32>, vector<8x8x8xf32> -> vector<8x8x8xf32>
    "tpu.trace_stop"() : () -> ()
    %cst_8 = arith.constant 0.353553385 : f32
    %36 = vector.broadcast %cst_8 : f32 to vector<8x8x8xf32>
    %37 = arith.mulf %35, %36 : vector<8x8x8xf32>
    %cst_9 = arith.constant dense<0xFF800000> : vector<8x8xf32>
    %38 = vector.multi_reduction <maximumf>, %37, %cst_9 [2] : vector<8x8x8xf32> to vector<8x8xf32>
    %39 = vector.shape_cast %38 : vector<8x8xf32> to vector<8x8x1xf32>
    %40 = vector.broadcast %39 : vector<8x8x1xf32> to vector<8x8x8xf32>
    %41 = arith.subf %37, %40 : vector<8x8x8xf32>
    %42 = math.exp %41 : vector<8x8x8xf32>
    %cst_10 = arith.constant dense<0.000000e+00> : vector<8x8xf32>
    %43 = vector.multi_reduction <add>, %42, %cst_10 [2] : vector<8x8x8xf32> to vector<8x8xf32>
    %44 = vector.shape_cast %43 : vector<8x8xf32> to vector<8x8x1xf32>
    %45 = vector.broadcast %44 : vector<8x8x1xf32> to vector<8x8x8xf32>
    %46 = arith.divf %42, %45 : vector<8x8x8xf32>
    "tpu.trace_start"() <{level = 10 : i32, message = "bnm,bmd->bnd"}> : () -> ()
    %cst_11 = arith.constant dense<0.000000e+00> : vector<8x8x8xf32>
    %47 = tpu.matmul %46, %34, %cst_11 {dimension_numbers = #tpu.dot_dimension_numbers<[2], [1], [1], [2], [0, 0, 0, 1, 1, 2], [0], [0]>} : vector<8x8x8xf32>, vector<8x8x8xf32>, vector<8x8x8xf32> -> vector<8x8x8xf32>
    %cst_12 = arith.constant 0.000000e+00 : f32
    "tpu.trace_stop"() : () -> ()
    %48 = vector.broadcast %cst_12 : f32 to vector<16x32xf32>
    %49 = vector.extract_strided_slice %47 {offsets = [0, 0, 0], sizes = [2, 8, 8], strides = [1, 1, 1]} : vector<8x8x8xf32> to vector<2x8x8xf32>
    %50 = vector.shape_cast %49 : vector<2x8x8xf32> to vector<16x8xf32>
    %51 = vector.extract_strided_slice %2 {offsets = [0, 0], sizes = [8, 32], strides = [1, 1]} : vector<32x32xf32> to vector<8x32xf32>
    %cst_13 = arith.constant dense<0.000000e+00> : vector<16x32xf32>
    %52 = tpu.matmul %50, %51, %cst_13 {dimension_numbers = #tpu.dot_dimension_numbers<[1], [0], [0], [1], [0, 0, 1, 1], [], []>} : vector<16x8xf32>, vector<8x32xf32>, vector<16x32xf32> -> vector<16x32xf32>
    %53 = arith.addf %48, %52 : vector<16x32xf32>
    %54 = vector.extract_strided_slice %47 {offsets = [2, 0, 0], sizes = [2, 8, 8], strides = [1, 1, 1]} : vector<8x8x8xf32> to vector<2x8x8xf32>
    %55 = vector.shape_cast %54 : vector<2x8x8xf32> to vector<16x8xf32>
    %56 = vector.extract_strided_slice %2 {offsets = [8, 0], sizes = [8, 32], strides = [1, 1]} : vector<32x32xf32> to vector<8x32xf32>
    %cst_14 = arith.constant dense<0.000000e+00> : vector<16x32xf32>
    %57 = tpu.matmul %55, %56, %cst_14 {dimension_numbers = #tpu.dot_dimension_numbers<[1], [0], [0], [1], [0, 0, 1, 1], [], []>} : vector<16x8xf32>, vector<8x32xf32>, vector<16x32xf32> -> vector<16x32xf32>
    %58 = arith.addf %53, %57 : vector<16x32xf32>
    %59 = vector.extract_strided_slice %47 {offsets = [4, 0, 0], sizes = [2, 8, 8], strides = [1, 1, 1]} : vector<8x8x8xf32> to vector<2x8x8xf32>
    %60 = vector.shape_cast %59 : vector<2x8x8xf32> to vector<16x8xf32>
    %61 = vector.extract_strided_slice %2 {offsets = [16, 0], sizes = [8, 32], strides = [1, 1]} : vector<32x32xf32> to vector<8x32xf32>
    %cst_15 = arith.constant dense<0.000000e+00> : vector<16x32xf32>
    %62 = tpu.matmul %60, %61, %cst_15 {dimension_numbers = #tpu.dot_dimension_numbers<[1], [0], [0], [1], [0, 0, 1, 1], [], []>} : vector<16x8xf32>, vector<8x32xf32>, vector<16x32xf32> -> vector<16x32xf32>
    %63 = arith.addf %58, %62 : vector<16x32xf32>
    %64 = vector.extract_strided_slice %47 {offsets = [6, 0, 0], sizes = [2, 8, 8], strides = [1, 1, 1]} : vector<8x8x8xf32> to vector<2x8x8xf32>
    %65 = vector.shape_cast %64 : vector<2x8x8xf32> to vector<16x8xf32>
    %66 = vector.extract_strided_slice %2 {offsets = [24, 0], sizes = [8, 32], strides = [1, 1]} : vector<32x32xf32> to vector<8x32xf32>
    %cst_16 = arith.constant dense<0.000000e+00> : vector<16x32xf32>
    %67 = tpu.matmul %65, %66, %cst_16 {dimension_numbers = #tpu.dot_dimension_numbers<[1], [0], [0], [1], [0, 0, 1, 1], [], []>} : vector<16x8xf32>, vector<8x32xf32>, vector<16x32xf32> -> vector<16x32xf32>
    %68 = arith.addf %63, %67 : vector<16x32xf32>
    %69 = vector.broadcast %3 : vector<1x32xf32> to vector<16x32xf32>
    %70 = arith.addf %68, %69 : vector<16x32xf32>
    %c0_17 = arith.constant 0 : index
    %c0_18 = arith.constant 0 : index
    %71 = vector.load %arg5[%c0_17, %c0_18] : memref<16x32xf32, #tpu.memory_space<vmem>>, vector<16x32xf32>
    tpu.vector_store %arg5[%c0_17, %c0_18], %70 {strides = array<i32>} : memref<16x32xf32, #tpu.memory_space<vmem>>, vector<16x32xf32>,
    return
  }
  func.func @transform_0(%arg0: i32) -> (i32, i32) {
    %c0_i32 = arith.constant 0 : i32
    %c0_i32_0 = arith.constant 0 : i32
    %c0_i32_1 = arith.constant 0 : i32
    return %c0_i32, %c0_i32_0 : i32, i32
  }
  func.func @transform_1(%arg0: i32) -> (i32, i32) {
    %c0_i32 = arith.constant 0 : i32
    %c0_i32_0 = arith.constant 0 : i32
    %c0_i32_1 = arith.constant 0 : i32
    return %c0_i32, %c0_i32_0 : i32, i32
  }
  func.func @transform_2(%arg0: i32) -> (i32, i32) {
    %c0_i32 = arith.constant 0 : i32
    %c0_i32_0 = arith.constant 0 : i32
    %c0_i32_1 = arith.constant 0 : i32
    return %c0_i32, %c0_i32_0 : i32, i32
  }
  func.func @transform_3(%arg0: i32) -> (i32, i32) {
    %c0_i32 = arith.constant 0 : i32
    %c0_i32_0 = arith.constant 0 : i32
    %c0_i32_1 = arith.constant 0 : i32
    return %c0_i32, %c0_i32_0 : i32, i32
  }
  func.func @transform_4(%arg0: i32) -> (i32, i32) {
    %c0_i32 = arith.constant 0 : i32
    %c0_i32_0 = arith.constant 0 : i32
    %c0_i32_1 = arith.constant 0 : i32
    return %c0_i32, %c0_i32_0 : i32, i32
  }
}

</mosaic_0001>

<bundles_post_ra>
// kernel: attention_forward.1
= control target key start
LH: loop header
LB: loop body
LE: loop exit
PB: predicated region body
PF: predicated region fallthrough
CT: control target
= control target key end

     0   :  { %9 = vsyncpa [#allocation3], 0  ;;  %s2446_s0 = inlined_call_operand.hbm [shape: f32[16,32], index: 0, kind: input, shape index: {}]   ;;  %s2447_s1 = inlined_call_operand.hbm [shape: f32[32,96], index: 1, kind: input, shape index: {}]   ;;  %s2448_s2 = inlined_call_operand.hbm [shape: f32[32,32], index: 2, kind: input, shape index: {}]   ;;  %s2449_s3 = inlined_call_operand.vmem [shape: f32[1,32], index: 3, kind: input, shape index: {}]   ;;  %s2450_s4 = inlined_call_operand.hbm [shape: f32[16,32], index: 4, kind: output, shape index: {}]  }
   0x1   :  { %10 = vsyncpa [#allocation6], 0 }
   0x2   :  { %11 = vsyncpa [#allocation4], 0  ;;  %s2184_s15 = smov [#allocation5]   ;;  %s2185_s17 = smov [#allocation2]  }
   0x3   :  { %s29_s16 = sshll.u32 %s2184_s15, 4  ;;  %s17_s18 = sshll.u32 %s2185_s17, 4  ;;  %s30_s16 = int_to_ptr.vmem [resolvable:$true] %s29_s16  ;;  %s2222_s18 = int_to_ptr.vmem [resolvable:$true] %s17_s18 }
   0x4   :  { %s2090_s21 = scalar_lea.hbm %s2447_s1, 512 }
   0x5   :  { %p2091_p0 = scmp.ne.s32.totalorder %s2447_s1, %s2090_s21  ;;  %p2094_p1 = scmp.lt.u32.totalorder %s2090_s21, %s2447_s1 }
   0x7   :  { %p2096_p2 = pnand %p2094_p1, %p2091_p0 }
   0x9   :  { %2099 = shalt.err (!%p2096_p2)
}
   0xa   :  { %s2100_s26 = scalar_lea.vmem %s30_s16, 512  ;;  %p2105_p4 = scmp.lt.s32.totalorder %s30_s16, %s30_s16 }
   0xb   :  { %p2101_p3 = scmp.ne.s32.totalorder %s30_s16, %s2100_s26  ;;  %p2106_p5 = scmp.lt.s32.totalorder %s2100_s26, %s2100_s26 }
   0xd   :  { %p2107_p6 = por %p2106_p5, %p2105_p4 }
   0xf   :  { %p2108_p7 = pnand %p2107_p6, %p2101_p3 }
  0x11   :  { %2111 = shalt.err (!%p2108_p7)
}
  0x12   :  { %s2186_s27 = smov 128   ;;  %s2187_s28 = smov 8  }
  0x13   :  { %35 = dma.hbm_to_vmem [thread:$0]  %s2447_s1, 512, %s30_s16, [#allocation6], %s2186_s27, %s2186_s27, %s2187_s28  }
  0x14   :  { %s2112_s7 = scalar_lea.hbm %s2446_s0, 256 }
  0x15   :  { %p2113_p8 = scmp.ne.s32.totalorder %s2446_s0, %s2112_s7  ;;  %p2116_p9 = scmp.lt.u32.totalorder %s2112_s7, %s2446_s0 }
  0x17   :  { %p2118_p10 = pnand %p2116_p9, %p2113_p8 }
  0x19   :  { %2121 = shalt.err (!%p2118_p10)
}
  0x1a   :  { %s2122_s12 = scalar_lea.vmem %s2222_s18, 256  ;;  %p2127_p12 = scmp.lt.s32.totalorder %s2222_s18, %s2222_s18 }
  0x1b   :  { %p2123_p11 = scmp.ne.s32.totalorder %s2222_s18, %s2122_s12  ;;  %p2128_p13 = scmp.lt.s32.totalorder %s2122_s12, %s2122_s12 }
  0x1d   :  { %p2129_p0 = por %p2128_p13, %p2127_p12 }
  0x1f   :  { %p2130_p1 = pnand %p2129_p0, %p2123_p11 }
  0x21   :  { %2133 = shalt.err (!%p2130_p1)
}
  0x22   :  { %23 = dma.hbm_to_vmem [thread:$0]  %s2446_s0, 256, %s2222_s18, [#allocation3], %s2186_s27, %s2186_s27, %s2187_s28  }
  0x23   :  { %s2188_s14 = smov [#allocation7]   ;;  %s2134_s19 = scalar_lea.hbm %s2448_s2, 512 }
  0x24   :  { %s41_s15 = sshll.u32 %s2188_s14, 4  ;;  %p2135_p2 = scmp.ne.s32.totalorder %s2448_s2, %s2134_s19  ;;  %s42_s15 = int_to_ptr.vmem [resolvable:$true] %s41_s15 }
  0x25   :  { %p2138_p3 = scmp.lt.u32.totalorder %s2134_s19, %s2448_s2 }
  0x27   :  { %p2140_p4 = pnand %p2138_p3, %p2135_p2 }
  0x29   :  { %2143 = shalt.err (!%p2140_p4)
}
  0x2a   :  { %s2144_s24 = scalar_lea.vmem %s42_s15, 512  ;;  %p2149_p6 = scmp.lt.s32.totalorder %s42_s15, %s42_s15 }
  0x2b   :  { %p2145_p5 = scmp.ne.s32.totalorder %s42_s15, %s2144_s24  ;;  %p2150_p7 = scmp.lt.s32.totalorder %s2144_s24, %s2144_s24 }
  0x2d   :  { %p2151_p8 = por %p2150_p7, %p2149_p6 }
  0x2f   :  { %p2152_p9 = pnand %p2151_p8, %p2145_p5 }
  0x31   :  { %2155 = shalt.err (!%p2152_p9)
}
  0x32   :  { %47 = dma.hbm_to_vmem [thread:$0]  %s2448_s2, 512, %s42_s15, [#allocation6], %s2186_s27, %s2186_s27, %s2187_s28  }
  0x33   :  { %2178 = dma.done.wait [#allocation3], 256  }
  0x34   :  { %2179 = vsyncadd [#allocation3], 4294967040 }
  0x35   :  { %2180 = dma.done.wait [#allocation6], 1024  }
  0x36   :  { %2181 = vsyncadd [#allocation6], 4294966272  ;;  %vm70_vm0 = vcmask 261120   ;;  %v61_v0 = vld [vmem:[#allocation5] sm:$0xff]  ;;  %v62_v1 = vld [vmem:[#allocation5 + $0x8] sm:$0xff]  ;;  %v2189_v8 = vmov 0.0  }
  0x37   :  { %v63_v2 = vld [vmem:[#allocation5 + $0x10] sm:$0xff]  ;;  %v2031_v3 = vpack.c.bf16 %v62_v1, %v61_v0  ;;  %v64_v4 = vld [vmem:[#allocation5 + $0x18] sm:$0xff]  ;;  %1941 = vmatprep.subr.mxu0 %v2189_v8  ;;  %s2190_s2 = smov 112   ;;  %s2191_s25 = smov 120   ;;  %vm2192_vm1 = vmmov 0   ;;  %vm168_vm2 = vcmask 64512  }
  0x38   :  { %v59_v5 = vld [vmem:[#allocation2] sm:$0xff]  ;;  %v2035_v6 = vpack.c.bf16 %v64_v4, %v63_v2  ;;  %v60_v7 = vld [vmem:[#allocation2 + $0x8] sm:$0xff]  ;;  %1943 = vmatprep.mubr.msk.f32.mxu0 %vm2192_vm1, %v2189_v8  ;;  %s2193_s26 = smov 104   ;;  %s2194_s29 = smov 96  }
  0x39   :  { %1928 = vmatprep.mubr.msk.f32.mxu1 %vm70_vm0, %v59_v5  ;;  %2032 = vmatprep.subr.bf16.mxu1 %v2031_v3  ;;  %s2195_s30 = smov 64   ;;  %s2196_s7 = smov [#allocation8]  }
  0x3a   :  { %2034 = vmatpush3.bf16.msra.mxu1 %v2031_v3  ;;  %s1822_s8 = sshll.u32 %s2196_s7, 4  ;;  %s1823_s8 = int_to_ptr.vmem [resolvable:$true] %s1822_s8 }
  0x3b   :  { %2036 = vmatprep.subr.bf16.mxu1 %v2035_v6  ;;  %s2156_s9 = scalar_lea.vmem %s1823_s8, 256  ;;  %p2161_p11 = scmp.lt.s32.totalorder %s1823_s8, %s1823_s8 }
  0x3c   :  { %p2157_p10 = scmp.ne.s32.totalorder %s1823_s8, %s2156_s9  ;;  %p2162_p12 = scmp.lt.s32.totalorder %s2156_s9, %s2156_s9 }
  0x3e   :  { %2038 = vmatpush3.bf16.msra.mxu1 %v2035_v6  ;;  %p2163_p13 = por %p2162_p12, %p2161_p11 }
  0x3f   :  { %1931 = vmatprep.subr.mxu1 %v2189_v8 }
  0x40   :  { %p2164_p0 = pnand %p2163_p13, %p2157_p10 }
  0x41   :  { %1929 = vmatmul.mubr.msk.f32.vlgmr.msra.gmra.mrb[0].mxu1 %vm70_vm0, %v60_v7 }
  0x42   :  { %1933 = vmatprep.mubr.msk.f32.mxu1 %vm2192_vm1, %v2189_v8 }
 0x114   :  { %v2278_v9 = vpop.f32.mrb[0].mxu1 }
 0x115   :  { %v143_v10 = vpop.f32.mrb[1].mxu1 }
 0x116   :  { %158 = vrot.lane.b32.xlu1 %v143_v10, %s2190_s2  ;;  %154 = vrot.lane.b32.xlu0 %v143_v10, %s2191_s25 }
 0x11a   :  { %160 = vrot.lane.b32.xlu1 %v2278_v9, %s2190_s2  ;;  %156 = vrot.lane.b32.xlu0 %v2278_v9, %s2191_s25 }
 0x11e   :  { %164 = vrot.lane.b32.xlu1 %v2278_v9, %s2193_s26  ;;  %162 = vrot.lane.b32.xlu0 %v143_v10, %s2193_s26 }
 0x122   :  { %243 = vrot.lane.b32.xlu1 %v2278_v9, %s2194_s29  ;;  %166 = vrot.lane.b32.xlu0 %v143_v10, %s2194_s29 }
 0x188   :  { %v2288_v11 = vpop.permute.xlu1 %158  ;;  %v2290_v12 = vpop.permute.xlu0 %154 }
 0x189   :  { %319 = vrot.lane.b32.xlu0 %v2290_v12, %s2194_s29 }
 0x18c   :  { %v2293_v13 = vpop.permute.xlu1 %160  ;;  %v2295_v14 = vpop.permute.xlu0 %156 }
 0x18d   :  { %471 = vrot.lane.b32.xlu0 %v2288_v11, %s2194_s29  ;;  %395 = vrot.lane.b32.xlu1 %v2295_v14, %s2194_s29 }
 0x190   :  { %v2299_v15 = vpop.permute.xlu0 %162  ;;  %v2303_v16 = vpop.permute.xlu1 %164 }
 0x191   :  { %547 = vrot.lane.b32.xlu1 %v2293_v13, %s2194_s29  ;;  %623 = vrot.lane.b32.xlu0 %v2299_v15, %s2194_s29 }
 0x194   :  { %v167_v17 = vpop.permute.xlu0 %166  ;;  %v244_v18 = vpop.permute.xlu1 %243 }
 0x195   :  { %699 = vrot.lane.b32.xlu1 %v2303_v16, %s2194_s29  ;;  %1932 = vmatpush3.xpose.msk.msra.mxu1 %vm168_vm2, %v167_v17 }
 0x196   :  { %1936 = vmatprep.subr.mxu1 %v2189_v8 }
 0x198   :  { %1934 = vmatmul.mubr.msk.f32.vlgmr.msra.gmra.mrb[2].mxu1 %vm168_vm2, %v143_v10 }
 0x199   :  { %871 = vrot.lane.b32.xlu1 %v143_v10, %s2195_s30  ;;  %1937 = vmatpush3.xpose.msk.msra.mxu1 %vm168_vm2, %v244_v18 }
 0x19a   :  { %1938 = vmatprep.mubr.msk.f32.mxu1 %vm2192_vm1, %v2189_v8  ;;  %1946 = vmatprep.subr.mxu1 %v2189_v8 }
 0x19c   :  { %1939 = vmatmul.mubr.msk.f32.vlgmr.msra.gmra.mrb[4].mxu1 %vm168_vm2, %v2278_v9 }
 0x19d   :  { %1948 = vmatprep.mubr.msk.f32.mxu1 %vm2192_vm1, %v2189_v8 }
 0x1fb   :  { %v320_v19 = vpop.permute.xlu0 %319 }
 0x1fc   :  { %1942 = vmatpush3.xpose.msk.msra.mxu0 %vm168_vm2, %v320_v19 }
 0x1fd   :  { %1951 = vmatprep.subr.mxu0 %v2189_v8 }
 0x1ff   :  { %v396_v20 = vpop.permute.xlu1 %395  ;;  %1944 = vmatmul.mubr.msk.f32.vlgmr.msra.gmra.mrb[0].mxu0 %vm168_vm2, %v2290_v12  ;;  %v472_v21 = vpop.permute.xlu0 %471 }
 0x200   :  { %1947 = vmatpush3.xpose.msk.msra.mxu1 %vm168_vm2, %v396_v20  ;;  %1952 = vmatpush3.xpose.msk.msra.mxu0 %vm168_vm2, %v472_v21 }
 0x201   :  { %1953 = vmatprep.mubr.msk.f32.mxu0 %vm2192_vm1, %v2189_v8  ;;  %1956 = vmatprep.subr.mxu1 %v2189_v8 }
 0x202   :  { %1961 = vmatprep.subr.mxu0 %v2189_v8 }
 0x203   :  { %v548_v22 = vpop.permute.xlu1 %547  ;;  %1949 = vmatmul.mubr.msk.f32.vlgmr.msra.gmra.mrb[6].mxu1 %vm168_vm2, %v2295_v14  ;;  %1954 = vmatmul.mubr.msk.f32.vlgmr.msra.gmra.mrb[2].mxu0 %vm168_vm2, %v2288_v11  ;;  %v624_v23 = vpop.permute.xlu0 %623 }
 0x204   :  { %1957 = vmatpush3.xpose.msk.msra.mxu1 %vm168_vm2, %v548_v22  ;;  %1962 = vmatpush3.xpose.msk.msra.mxu0 %vm168_vm2, %v624_v23 }
 0x205   :  { %1958 = vmatprep.mubr.msk.f32.mxu1 %vm2192_vm1, %v2189_v8  ;;  %1963 = vmatprep.mubr.msk.f32.mxu0 %vm2192_vm1, %v2189_v8 }
 0x206   :  { %1966 = vmatprep.subr.mxu1 %v2189_v8  ;;  %1971 = vmatprep.subr.mxu0 %v2189_v8 }
 0x207   :  { %v700_v24 = vpop.permute.xlu1 %699  ;;  %1959 = vmatmul.mubr.msk.f32.vlgmr.msra.gmra.mrb[8].mxu1 %vm168_vm2, %v2293_v13  ;;  %1964 = vmatmul.mubr.msk.f32.vlgmr.msra.gmra.mrb[4].mxu0 %vm168_vm2, %v2299_v15 }
 0x208   :  { %1967 = vmatpush3.xpose.msk.msra.mxu1 %vm168_vm2, %v700_v24  ;;  %1968 = vmatprep.mubr.msk.f32.mxu1 %vm2192_vm1, %v2189_v8 }
 0x209   :  { %1976 = vmatprep.subr.mxu1 %v2189_v8  ;;  %1973 = vmatprep.mubr.msk.f32.mxu0 %vm2192_vm1, %v2189_v8 }
 0x20b   :  { %v872_v25 = vpop.permute.xlu1 %871  ;;  %1969 = vmatmul.mubr.msk.f32.vlgmr.msra.gmra.mrb[10].mxu1 %vm168_vm2, %v2303_v16 }
 0x20c   :  { %1972 = vmatpush3.msra.mxu0 %v872_v25  ;;  %1978 = vmatprep.mubr.msk.f32.mxu1 %vm2192_vm1, %v2189_v8 }
 0x20d   :  { %1981 = vmatprep.subr.mxu0 %v2189_v8 }
 0x26b   :  { %v239_v26 = vpop.f32.mrb[2].mxu1 }
 0x26c   :  { %v775_v27 = vmul.f32 0.35355338, %v239_v26  ;;  %v1935_v28 = vpop.f32.mrb[3].mxu1 }
 0x26e   :  { %v783_v29 = vsel %vm168_vm2, %v775_v27, -inf }
 0x26f   :  { %784 = vmax.xlane.f32.xlu0 %v783_v29  ;;  %v315_v30 = vpop.f32.mrb[4].mxu1 }
 0x270   :  { %v776_v31 = vmul.f32 0.35355338, %v315_v30  ;;  %v1940_v32 = vpop.f32.mrb[5].mxu1 }
 0x272   :  { %v786_v33 = vsel %vm168_vm2, %v776_v31, -inf }
 0x273   :  { %787 = vmax.xlane.f32.xlu1 %v786_v33 }
 0x2d2   :  { %v391_v34 = vpop.f32.mrb[0].mxu0 }
 0x2d3   :  { %v1945_v35 = vpop.f32.mrb[1].mxu0  ;;  %v777_v42 = vmul.f32 0.35355338, %v391_v34 }
 0x2d5   :  { %v789_v50 = vsel %vm168_vm2, %v777_v42, -inf }
 0x2d6   :  { %v467_v36 = vpop.f32.mrb[6].mxu1  ;;  %v543_v37 = vpop.f32.mrb[2].mxu0 }
 0x2d7   :  { %v778_v38 = vmul.f32 0.35355338, %v467_v36  ;;  %v2357_v39 = vmul.f32 0.35355338, %v543_v37  ;;  %v1950_v40 = vpop.f32.mrb[7].mxu1  ;;  %v1955_v41 = vpop.f32.mrb[3].mxu0 }
 0x2d9   :  { %v792_v43 = vsel %vm168_vm2, %v778_v38, -inf  ;;  %v795_v44 = vsel %vm168_vm2, %v2357_v39, -inf }
 0x2da   :  { %793 = vmax.xlane.f32.xlu0 %v792_v43  ;;  %v619_v45 = vpop.f32.mrb[8].mxu1  ;;  %796 = vmax.xlane.f32.xlu1 %v795_v44  ;;  %v695_v46 = vpop.f32.mrb[4].mxu0 }
 0x2db   :  { %v1960_v47 = vpop.f32.mrb[9].mxu1  ;;  %v1965_v48 = vpop.f32.mrb[5].mxu0  ;;  %v780_v49 = vmul.f32 0.35355338, %v619_v45  ;;  %v781_v62 = vmul.f32 0.35355338, %v695_v46 }
 0x2dd   :  { %v798_v54 = vsel %vm168_vm2, %v780_v49, -inf  ;;  %v801_v63 = vsel %vm168_vm2, %v781_v62, -inf }
 0x2de   :  { %v771_v51 = vpop.f32.mrb[10].mxu1  ;;  %790 = vmax.xlane.f32.xlu0 %v789_v50 }
 0x2df   :  { %v1970_v52 = vpop.f32.mrb[11].mxu1  ;;  %v782_v53 = vmul.f32 0.35355338, %v771_v51 }
 0x2e1   :  { %v804_v55 = vsel %vm168_vm2, %v782_v53, -inf }
 0x2e2   :  { %799 = vmax.xlane.f32.xlu0 %v798_v54 }
 0x2e6   :  { %805 = vmax.xlane.f32.xlu0 %v804_v55 }
 0x2eb   :  { %1023 = vrot.lane.b32.xlu1 %v2290_v12, %s2195_s30 }
 0x2fc   :  { %947 = vrot.lane.b32.xlu0 %v2278_v9, %s2195_s30  ;;  %v785_v56 = vpop.xlane.xlu0 %784 }
 0x2fd   :  { %v807_v57 = vsub.f32 %v775_v27, %v785_v56 }
 0x2ff   :  { %v815_v58 = vmul.f32 1.442695, %v807_v57 }
 0x300   :  { %v788_v59 = vpop.xlane.xlu1 %787 }
 0x301   :  { %2058 = vpow2.f32 %v815_v58  ;;  %v808_v60 = vsub.f32 %v776_v31, %v788_v59 }
 0x303   :  { %v817_v61 = vmul.f32 1.442695, %v808_v60 }
 0x305   :  { %2060 = vpow2.f32 %v817_v61 }
 0x30b   :  { %v2059_v0 = vpop.eup %2058 }
 0x30c   :  { %v831_v1 = vsel %vm168_vm2, %v2059_v0, 0.0 }
 0x30f   :  { %802 = vmax.xlane.f32.xlu1 %v801_v63  ;;  %v2061_v2 = vpop.eup %2060 }
 0x310   :  { %v834_v3 = vsel %vm168_vm2, %v2061_v2, 0.0 }
 0x313   :  { %832 = vadd.xlane.f32.xlu1 %v831_v1 }
 0x31b   :  { %835 = vadd.xlane.f32.xlu0 %v834_v3  ;;  %v65_v3 = vld [vmem:[#allocation7] sm:$0xff] }
 0x324   :  { %1175 = vrot.lane.b32.xlu1 %v2288_v11, %s2195_s30 }
 0x367   :  { %v794_v4 = vpop.xlane.xlu0 %793  ;;  %v797_v22 = vpop.xlane.xlu1 %796 }
 0x368   :  { %v810_v5 = vsub.f32 %v778_v38, %v794_v4  ;;  %v811_v25 = vsub.f32 %v2357_v39, %v797_v22 }
 0x36a   :  { %v821_v6 = vmul.f32 1.442695, %v810_v5  ;;  %v823_v29 = vmul.f32 1.442695, %v811_v25 }
 0x36b   :  { %v791_v7 = vpop.xlane.xlu0 %790  ;;  %v1024_v23 = vpop.permute.xlu1 %1023 }
 0x36c   :  { %v809_v9 = vsub.f32 %v777_v42, %v791_v7  ;;  %2062 = vpow2.f32 %v821_v6 }
 0x36e   :  { %v819_v10 = vmul.f32 1.442695, %v809_v9 }
 0x36f   :  { %v800_v12 = vpop.xlane.xlu0 %799 }
 0x370   :  { %2064 = vpow2.f32 %v819_v10  ;;  %v812_v24 = vsub.f32 %v780_v49, %v800_v12 }
 0x372   :  { %v825_v26 = vmul.f32 1.442695, %v812_v24 }
 0x373   :  { %v806_v17 = vpop.xlane.xlu0 %805 }
 0x374   :  { %v814_v27 = vsub.f32 %v782_v53, %v806_v17  ;;  %2066 = vpow2.f32 %v825_v26  ;;  %v1869_v26 = vld [vmem:[%s2449_s3] ss:$0 sm:$0xff] }
 0x376   :  { %v2374_v18 = vpop.eup %2062  ;;  %v829_v31 = vmul.f32 1.442695, %v814_v27 }
 0x377   :  { %v948_v19 = vpop.permute.xlu0 %947  ;;  %v840_v20 = vsel %vm168_vm2, %v2374_v18, 0.0 }
 0x378   :  { %1977 = vmatpush3.msra.mxu1 %v948_v19  ;;  %841 = vadd.xlane.f32.xlu0 %v840_v20 }
 0x379   :  { %1986 = vmatprep.subr.mxu1 %v2189_v8 }
 0x37a   :  { %v2065_v11 = vpop.eup %2064 }
 0x37b   :  { %v837_v21 = vsel %vm168_vm2, %v2065_v11, 0.0 }
 0x37c   :  { %838 = vadd.xlane.f32.xlu1 %v837_v21 }
 0x38d   :  { %1251 = vrot.lane.b32.xlu1 %v2293_v13, %s2195_s30 }
 0x38e   :  { %1099 = vrot.lane.b32.xlu0 %v2295_v14, %s2195_s30  ;;  %v2067_v14 = vpop.eup %2066 }
 0x38f   :  { %v846_v37 = vsel %vm168_vm2, %v2067_v14, 0.0 }
 0x39c   :  { %v803_v28 = vpop.xlane.xlu1 %802 }
 0x39d   :  { %v813_v30 = vsub.f32 %v781_v62, %v803_v28 }
 0x39f   :  { %v827_v33 = vmul.f32 1.442695, %v813_v30 }
 0x3a0   :  { %v833_v32 = vpop.xlane.xlu1 %832 }
 0x3a1   :  { %2068 = vrcp.f32 %v833_v32 }
 0x3a2   :  { %2070 = vpow2.f32 %v823_v29 }
 0x3a3   :  { %2072 = vpow2.f32 %v829_v31 }
 0x3a4   :  { %2074 = vpow2.f32 %v827_v33  ;;  %v1176_v45 = vpop.permute.xlu1 %1175 }
 0x3a8   :  { %v836_v13 = vpop.xlane.xlu0 %835 }
 0x3a9   :  { %2076 = vrcp.f32 %v836_v13 }
 0x3ab   :  { %v2069_v34 = vpop.eup %2068 }
 0x3ac   :  { %v2071_v35 = vpop.eup %2070  ;;  %v856_v36 = vmul.f32 %v2069_v34, %v2059_v0 }
 0x3ad   :  { %v2073_v38 = vpop.eup %2072  ;;  %847 = vadd.xlane.f32.xlu0 %v846_v37  ;;  %v843_v39 = vsel %vm168_vm2, %v2071_v35, 0.0 }
 0x3ae   :  { %1974 = vmatmul.mubr.msk.f32.vlgmr.msra.gmra.mrb[6].mxu0 %vm168_vm2, %v856_v36  ;;  %v2075_v40 = vpop.eup %2074  ;;  %v852_v41 = vsel %vm168_vm2, %v2073_v38, 0.0 }
 0x3af   :  { %1982 = vmatpush3.msra.mxu0 %v1024_v23  ;;  %1983 = vmatprep.mubr.msk.f32.mxu0 %vm2192_vm1, %v2189_v8  ;;  %v849_v44 = vsel %vm168_vm2, %v2075_v40, 0.0 }
 0x3b0   :  { %1991 = vmatprep.subr.mxu0 %v2189_v8 }
 0x3b1   :  { %844 = vadd.xlane.f32.xlu1 %v843_v39  ;;  %853 = vadd.xlane.f32.xlu0 %v852_v41 }
 0x3b3   :  { %v2077_v42 = vpop.eup %2076 }
 0x3b4   :  { %v858_v43 = vmul.f32 %v2077_v42, %v2061_v2  ;;  %v66_v2 = vld [vmem:[#allocation7 + $0x8] sm:$0xff] }
 0x3b5   :  { %850 = vadd.xlane.f32.xlu1 %v849_v44 }
 0x3b6   :  { %1979 = vmatmul.mubr.msk.f32.vlgmr.msra.gmra.mrb[12].mxu1 %vm168_vm2, %v858_v43 }
 0x3b7   :  { %1988 = vmatprep.mubr.msk.f32.mxu1 %vm2192_vm1, %v2189_v8 }
 0x3c6   :  { %1403 = vrot.lane.b32.xlu1 %v2303_v16, %s2195_s30 }
 0x3c7   :  { %1327 = vrot.lane.b32.xlu0 %v2299_v15, %s2195_s30 }
 0x405   :  { %v842_v46 = vpop.xlane.xlu0 %841 }
 0x406   :  { %2078 = vrcp.f32 %v842_v46 }
 0x409   :  { %v839_v47 = vpop.xlane.xlu1 %838  ;;  %v1100_v48 = vpop.permute.xlu0 %1099 }
 0x40a   :  { %2080 = vrcp.f32 %v839_v47  ;;  %1987 = vmatpush3.msra.mxu1 %v1100_v48 }
 0x40b   :  { %1996 = vmatprep.subr.mxu1 %v2189_v8 }
 0x40d   :  { %v1252_v52 = vpop.permute.xlu1 %1251 }
 0x410   :  { %v2079_v49 = vpop.eup %2078 }
 0x411   :  { %v862_v50 = vmul.f32 %v2079_v49, %v2374_v18  ;;  %v67_v18 = vld [vmem:[#allocation7 + $0x10] sm:$0xff] }
 0x413   :  { %1989 = vmatmul.mubr.msk.f32.vlgmr.msra.gmra.mrb[14].mxu1 %vm168_vm2, %v862_v50 }
 0x414   :  { %v2081_v51 = vpop.eup %2080  ;;  %1997 = vmatpush3.msra.mxu1 %v1252_v52  ;;  %1998 = vmatprep.mubr.msk.f32.mxu1 %vm2192_vm1, %v2189_v8 }
 0x415   :  { %v860_v16 = vmul.f32 %v2081_v51, %v2065_v11  ;;  %2006 = vmatprep.subr.mxu1 %v2189_v8 }
 0x417   :  { %1984 = vmatmul.mubr.msk.f32.vlgmr.msra.gmra.mrb[8].mxu0 %vm168_vm2, %v860_v16 }
 0x418   :  { %1992 = vmatpush3.msra.mxu0 %v1176_v45  ;;  %1993 = vmatprep.mubr.msk.f32.mxu0 %vm2192_vm1, %v2189_v8 }
 0x419   :  { %2001 = vmatprep.subr.mxu0 %v2189_v8 }
 0x43a   :  { %v848_v15 = vpop.xlane.xlu0 %847 }
 0x43b   :  { %2082 = vrcp.f32 %v848_v15 }
 0x43e   :  { %v845_v53 = vpop.xlane.xlu1 %844  ;;  %v854_v54 = vpop.xlane.xlu0 %853 }
 0x43f   :  { %2084 = vrcp.f32 %v845_v53 }
 0x440   :  { %2086 = vrcp.f32 %v854_v54 }
 0x442   :  { %v851_v55 = vpop.xlane.xlu1 %850  ;;  %v1328_v63 = vpop.permute.xlu0 %1327 }
 0x443   :  { %2088 = vrcp.f32 %v851_v55 }
 0x445   :  { %v2083_v56 = vpop.eup %2082 }
 0x446   :  { %v866_v57 = vmul.f32 %v2083_v56, %v2067_v14  ;;  %v1404_v58 = vpop.permute.xlu1 %1403 }
 0x448   :  { %1999 = vmatmul.mubr.msk.f32.vlgmr.msra.gmra.mrb[16].mxu1 %vm168_vm2, %v866_v57 }
 0x449   :  { %v2085_v59 = vpop.eup %2084  ;;  %2007 = vmatpush3.msra.mxu1 %v1404_v58  ;;  %2008 = vmatprep.mubr.msk.f32.mxu1 %vm2192_vm1, %v2189_v8 }
 0x44a   :  { %v2087_v60 = vpop.eup %2086  ;;  %v864_v61 = vmul.f32 %v2085_v59, %v2071_v35 }
 0x44b   :  { %v870_v62 = vmul.f32 %v2087_v60, %v2073_v38 }
 0x44c   :  { %1994 = vmatmul.mubr.msk.f32.vlgmr.msra.gmra.mrb[10].mxu0 %vm168_vm2, %v864_v61 }
 0x44d   :  { %v2089_v0 = vpop.eup %2088  ;;  %2002 = vmatpush3.msra.mxu0 %v1328_v63  ;;  %2009 = vmatmul.mubr.msk.f32.vlgmr.msra.gmra.mrb[18].mxu1 %vm168_vm2, %v870_v62 }
 0x44e   :  { %v868_v1 = vmul.f32 %v2089_v0, %v2075_v40  ;;  %2003 = vmatprep.mubr.msk.f32.mxu0 %vm2192_vm1, %v2189_v8  ;;  %2011 = vmatprep.subr.mxu0 %v66_v2  ;;  %v68_v8 = vld [vmem:[#allocation7 + $0x18] sm:$0xff] }
 0x450   :  { %2004 = vmatmul.mubr.msk.f32.vlgmr.msra.gmra.mrb[12].mxu0 %vm168_vm2, %v868_v1 }
 0x451   :  { %2012 = vmatpush3.msra.mxu0 %v66_v2 }
 0x452   :  { %2016 = vmatprep.subr.mxu0 %v65_v3 }
 0x481   :  { %v943_v4 = vpop.f32.mrb[6].mxu0 }
 0x482   :  { %v1975_v5 = vpop.f32.mrb[7].mxu0 }
 0x489   :  { %v1019_v6 = vpop.f32.mrb[12].mxu1 }
 0x48a   :  { %v1980_v7 = vpop.f32.mrb[13].mxu1 }
 0x4e6   :  { %v1171_v9 = vpop.f32.mrb[14].mxu1 }
 0x4e7   :  { %v1990_v10 = vpop.f32.mrb[15].mxu1 }
 0x4ea   :  { %v1095_v12 = vpop.f32.mrb[8].mxu0 }
 0x4eb   :  { %v1985_v17 = vpop.f32.mrb[9].mxu0  ;;  %2013 = vmatprep.mubr.msk.f32.mxu0 %vm168_vm2, %v1095_v12 }
 0x4ec   :  { %2014 = vmatmul.mubr.msk.f32.vlgmr.msra.gmra.mrb[14].mxu0 %vm168_vm2, %v1171_v9 }
 0x4ed   :  { %2018 = vmatprep.mubr.msk.f32.mxu0 %vm168_vm2, %v943_v4  ;;  %2017 = vmatpush3.msra.mxu0 %v65_v3 }
 0x4ee   :  { %2021 = vmatprep.subr.mxu0 %v67_v18 }
 0x4f4   :  { %2019 = vmatmul.mubr.msk.f32.vlgmr.msra.gmra.mrb[14].mxu0 %vm168_vm2, %v1019_v6 }
 0x4f5   :  { %2022 = vmatpush3.msra.mxu0 %v67_v18 }
 0x4f6   :  { %2026 = vmatprep.subr.mxu0 %v68_v8 }
 0x51b   :  { %v1323_v19 = vpop.f32.mrb[16].mxu1 }
 0x51c   :  { %v2000_v20 = vpop.f32.mrb[17].mxu1 }
 0x51f   :  { %v1247_v11 = vpop.f32.mrb[10].mxu0 }
 0x520   :  { %v1475_v21 = vpop.f32.mrb[18].mxu1  ;;  %v1995_v22 = vpop.f32.mrb[11].mxu0  ;;  %2023 = vmatprep.mubr.msk.f32.mxu0 %vm168_vm2, %v1247_v11 }
 0x521   :  { %v2010_v23 = vpop.f32.mrb[19].mxu1  ;;  %2024 = vmatmul.mubr.msk.f32.vlgmr.msra.gmra.mrb[14].mxu0 %vm168_vm2, %v1323_v19 }
 0x522   :  { %2027 = vmatpush3.msra.mxu0 %v68_v8 }
 0x523   :  { %v1399_v24 = vpop.f32.mrb[12].mxu0 }
 0x524   :  { %v2005_v25 = vpop.f32.mrb[13].mxu0  ;;  %2028 = vmatprep.mubr.msk.f32.mxu0 %vm168_vm2, %v1399_v24 }
 0x529   :  { %2029 = vmatmul.mubr.msk.f32.vlgmr.msra.gmra.mrb[14].mxu0 %vm168_vm2, %v1475_v21 }
 0x5fc   :  { %v2030_v27 = vpop.f32.mrb[14].mxu0 }
 0x5fd   :  { %v1814_v28 = vadd.f32 %v2030_v27, %v1869_v26  ;;  %v1796_v29 = vpop.f32.mrb[15].mxu0 }
 0x5fe   :  { %v1813_v30 = vadd.f32 %v1869_v26, %v1796_v29 }
 0x5ff   :  { %1816 = vst.msk [vmem:[#allocation8 + $0x8] sm:$0xff] %vm70_vm0, %v1814_v28 }
 0x600   :  { %1815 = vst.msk [vmem:[#allocation8] sm:$0xff] %vm70_vm0, %v1813_v30 }
 0x601   :  { %2167 = shalt.err (!%p2164_p0)
}
 0x602   :  { %s2168_s11 = scalar_lea.hbm %s2450_s4, 256 }
 0x603   :  { %p2169_p1 = scmp.ne.s32.totalorder %s2450_s4, %s2168_s11  ;;  %p2172_p2 = scmp.lt.u32.totalorder %s2168_s11, %s2450_s4 }
 0x605   :  { %p2174_p3 = pnand %p2172_p2, %p2169_p1 }
 0x607   :  { %2177 = shalt.err (!%p2174_p3)
}
 0x608   :  { %1828 = dma.vmem_to_hbm [thread:$0]  %s1823_s8, 256, %s2450_s4, [#allocation4], %s2186_s27, %s2186_s27, %s2187_s28  }
 0x609   :  { %2182 = dma.done.wait [#allocation4], 256  }
 0x60a   :  { %2183 = vsyncadd [#allocation4], 4294967040 }
 0x60b   :  { %1832 = vsyncpa [#allocation3], 1 }
 0x60c   :  { %1833 = vsyncpa [#allocation6], 1 }
 0x60d   :  { %1834 = vsyncpa [#allocation4], 1 }

</bundles_post_ra>
